<compile_context>
chip_gen: v7x
topology: tpu7x:2x2x1
jax: 0.10.0
libtpu: 0.0.40
codegen_flags: <defaults>
</compile_context>

<pallas_src>
import math

import jax
import jax.numpy as jnp
from jax.experimental import pallas as pl
from jax.experimental.pallas import tpu as pltpu

# ---- model hyperparameters (small, consistent with the module) ----
D_MODEL = 32
NUM_HEADS = 4
HEAD_DIM = D_MODEL // NUM_HEADS
D_FF = 64
EPS = 1e-5            # nn.LayerNorm default eps
NEG_INF = -1e9        # finite "-inf"; fine at f32


def _decoder_layer_kernel(x_ref, amask_ref, kpm_ref,
                          wqkv_ref, wo_ref, wf1_ref, wf2_ref, ln_ref,
                          out_ref, ctx_scr):
    """Single invocation; every operand is a whole-array VMEM block.

    x_ref     : (B*L, D)       activations, batch flattened into sublanes
    amask_ref : (L, L)         additive attention mask (e.g. causal)
    kpm_ref   : (B, L)         additive key-padding bias (0 or NEG_INF)
    wqkv_ref  : (D+1, 3D)      rows 0..D-1 = [Wq*scale | Wk | Wv], row D = fused bias
    wo_ref    : (D+1, D)       rows 0..D-1 = Wo, row D = bo
    wf1_ref   : (D+1, DFF)     rows 0..D-1 = W1, row D = b_ffn1
    wf2_ref   : (DFF+1, D)     rows 0..DFF-1 = W2 (untransposed), row DFF = b_ffn2
    ln_ref    : (4, D)         rows = g1, b1, g2, b2
    out_ref   : (B*L, D+L)     lanes [0,D) = layer output, lanes [D,D+L) = attn weights
    ctx_scr   : (B*L, D)       VMEM scratch for per-head attention contexts
    """
    x = x_ref[...]                                   # (B*L, D) f32
    B, L = kpm_ref.shape
    D = D_MODEL

    # ---------------- LayerNorm 1 (pre-attention) ----------------
    g1 = ln_ref[0:1, :]
    b1 = ln_ref[1:2, :]
    mu1 = jnp.mean(x, axis=-1, keepdims=True)
    var1 = jnp.mean((x - mu1) ** 2, axis=-1, keepdims=True)
    xn = (x - mu1) * jax.lax.rsqrt(var1 + EPS) * g1 + b1

    # -------- fused QKV projection: one (B*L, D) x (D, 3D) MXU matmul --------
    # 1/sqrt(head_dim) is folded into the Wq / bq columns at pack time.
    qkv = jnp.dot(xn, wqkv_ref[0:D, :],
                  preferred_element_type=jnp.float32) + wqkv_ref[D:D + 1, :]
    q = qkv[:, 0:D]
    k = qkv[:, D:2 * D]
    v = qkv[:, 2 * D:3 * D]

    amask = amask_ref[...]                           # (L, L) additive
    kpm = kpm_ref[...]                               # (B, L) additive
    inv_h = 1.0 / NUM_HEADS

    for b in range(B):                               # static, B == 2
        row = b * L
        qb = q[row:row + L, :]                       # 8-sublane-aligned slices
        kb = k[row:row + L, :]
        vb = v[row:row + L, :]
        mask_b = amask + kpm[b:b + 1, :]             # broadcast padding over query rows

        attw_b = jnp.zeros((L, L), jnp.float32)
        for h in range(NUM_HEADS):                   # static
            lo = h * HEAD_DIM
            hi = lo + HEAD_DIM
            # scores = q_h @ k_h^T (scale already folded into q)
            s = jax.lax.dot_general(qb[:, lo:hi], kb[:, lo:hi],
                                    (((1,), (1,)), ((), ())),
                                    preferred_element_type=jnp.float32)
            s = s + mask_b
            m = jnp.max(s, axis=-1, keepdims=True)
            p = jnp.exp(s - m)
            p = p * pl.reciprocal(jnp.sum(p, axis=-1, keepdims=True), approx=True)
            attw_b = attw_b + p
            # write per-head context straight into the (B*L, D) scratch slab
            ctx_scr[row:row + L, lo:hi] = jnp.dot(p, vb[:, lo:hi],
                                                  preferred_element_type=jnp.float32)
        # head-averaged attention weights, written into the combined output slab
        out_ref[row:row + L, D:D + L] = attw_b * inv_h

    # ------------- output projection (single matmul) + residual -------------
    ao = jnp.dot(ctx_scr[...], wo_ref[0:D, :],
                 preferred_element_type=jnp.float32) + wo_ref[D:D + 1, :]
    x2 = x + ao                                      # dropout1 == identity (eval)

    # ---------------- LayerNorm 2 (pre-FFN) ----------------
    g2 = ln_ref[2:3, :]
    b2 = ln_ref[3:4, :]
    mu2 = jnp.mean(x2, axis=-1, keepdims=True)
    var2 = jnp.mean((x2 - mu2) ** 2, axis=-1, keepdims=True)
    xn2 = (x2 - mu2) * jax.lax.rsqrt(var2 + EPS) * g2 + b2

    # -------- FFN: Linear -> GELU -> (dropout=id) -> Linear (no residual) --------
    # TODO(synk): tanh-approx GELU used for robust TPU lowering (PyTorch nn.GELU is erf).
    hdn = jnp.dot(xn2, wf1_ref[0:D, :],
                  preferred_element_type=jnp.float32) + wf1_ref[D:D + 1, :]
    hdn = jax.nn.gelu(hdn, approximate=True)
    # plain (B*L, DFF) x (DFF, D) dot: W2 stored untransposed -> no XLU transpose
    out = jnp.dot(hdn, wf2_ref[0:D_FF, :],
                  preferred_element_type=jnp.float32) + wf2_ref[D_FF:D_FF + 1, :]
    out_ref[:, 0:D] = out


def pack_params(params):
    """One-time weight packing. Call at weight-load time, NOT per forward."""
    scale = 1.0 / math.sqrt(HEAD_DIM)
    w_qkv = jnp.concatenate(
        [jnp.concatenate([params["wq"] * scale, params["wk"], params["wv"]], axis=1),
         jnp.concatenate([params["bq"] * scale, params["bk"], params["bv"]], axis=1)],
        axis=0)                                                        # (D+1, 3D)
    w_o = jnp.concatenate([params["wo"], params["bo"]], axis=0)        # (D+1, D)
    w_f1 = jnp.concatenate([params["w1"], params["bf1"]], axis=0)      # (D+1, DFF)
    w_f2 = jnp.concatenate([params["w2"], params["bf2"]], axis=0)      # (DFF+1, D), untransposed
    ln = jnp.concatenate([params["g1"], params["b1"],
                          params["g2"], params["b2"]], axis=0)         # (4, D)
    return {"w_qkv": w_qkv, "w_o": w_o, "w_f1": w_f1, "w_f2": w_f2, "ln": ln}


@jax.jit
def self_attention_decoder_layer(x, attn_mask, key_padding_mask, packed):
    """x: (B, L, D) f32.  attn_mask: (L, L) additive f32 (e.g. causal).
    key_padding_mask: (B, L) bool, True == padded key.  packed: from pack_params().
    Returns (out (B, L, D), attn_weights (B, L, L))."""
    B, L, D = x.shape

    # bool -> additive float bias; a (B, L) select, negligible next to the
    # hoisted weight-slab packing (kept here for bool-mask API parity).
    kpm_bias = jnp.where(key_padding_mask, NEG_INF, 0.0).astype(jnp.float32)
    x2d = x.reshape(B * L, D)                                          # free reshape

    vmem = pltpu.MemorySpace.VMEM
    slab = pl.pallas_call(
        _decoder_layer_kernel,
        out_shape=jax.ShapeDtypeStruct((B * L, D + L), jnp.float32),
        in_specs=[pl.BlockSpec(memory_space=vmem)] * 8,
        out_specs=pl.BlockSpec(memory_space=vmem),
        scratch_shapes=[pltpu.VMEM((B * L, D), jnp.float32)],
    )(x2d, attn_mask.astype(jnp.float32), kpm_bias,
      packed["w_qkv"], packed["w_o"], packed["w_f1"], packed["w_f2"], packed["ln"])

    out = slab[:, :D].reshape(B, L, D)
    attw = slab[:, D:].reshape(B, L, L)
    return out, attw


# ---------------------------------------------------------------------------
# Pure-JAX reference (same math) for correctness validation.
# ---------------------------------------------------------------------------
def _reference(x, attn_mask, key_padding_mask, p):
    def ln(t, g, b):
        mu = jnp.mean(t, -1, keepdims=True)
        var = jnp.mean((t - mu) ** 2, -1, keepdims=True)
        return (t - mu) / jnp.sqrt(var + EPS) * g + b

    B, L, D = x.shape
    pad_add = jnp.where(key_padding_mask, NEG_INF, 0.0).astype(jnp.float32)[:, None, :]
    combined = attn_mask[None, :, :] + pad_add                  # (B, L, L)

    xn = ln(x, p["g1"], p["b1"])
    q = xn @ p["wq"] + p["bq"]
    k = xn @ p["wk"] + p["bk"]
    v = xn @ p["wv"] + p["bv"]
    qh = q.reshape(B, L, NUM_HEADS, HEAD_DIM)
    kh = k.reshape(B, L, NUM_HEADS, HEAD_DIM)
    vh = v.reshape(B, L, NUM_HEADS, HEAD_DIM)
    s = jnp.einsum("bqhd,bkhd->bhqk", qh, kh) / math.sqrt(HEAD_DIM)
    s = s + combined[:, None]
    a = jax.nn.softmax(s, axis=-1)
    attw = a.mean(axis=1)
    ctx = jnp.einsum("bhqk,bkhd->bqhd", a, vh).reshape(B, L, D)
    ao = ctx @ p["wo"] + p["bo"]
    x2 = x + ao
    xn2 = ln(x2, p["g2"], p["b2"])
    h = jax.nn.gelu(xn2 @ p["w1"] + p["bf1"], approximate=True)
    out = h @ p["w2"] + p["bf2"]
    return out, attw


def _init_params(key):
    ks = jax.random.split(key, 16)
    n = lambda k, shape, s=0.05: (jax.random.normal(k, shape, jnp.float32) * s)
    return {
        "g1": 1.0 + n(ks[0], (1, D_MODEL)),
        "b1": n(ks[1], (1, D_MODEL)),
        "wq": n(ks[2], (D_MODEL, D_MODEL)),
        "bq": n(ks[3], (1, D_MODEL)),
        "wk": n(ks[4], (D_MODEL, D_MODEL)),
        "bk": n(ks[5], (1, D_MODEL)),
        "wv": n(ks[6], (D_MODEL, D_MODEL)),
        "bv": n(ks[7], (1, D_MODEL)),
        "wo": n(ks[8], (D_MODEL, D_MODEL)),
        "bo": n(ks[9], (1, D_MODEL)),
        "g2": 1.0 + n(ks[10], (1, D_MODEL)),
        "b2": n(ks[11], (1, D_MODEL)),
        "w1": n(ks[12], (D_MODEL, D_FF)),
        "bf1": n(ks[13], (1, D_FF)),
        "w2": n(ks[14], (D_FF, D_MODEL)),
        "bf2": n(ks[15], (1, D_MODEL)),
    }


if __name__ == "__main__":
    B, L = 2, 8
    key = jax.random.PRNGKey(0)
    kx, kp = jax.random.split(key)

    x = jax.random.normal(kx, (B, L, D_MODEL), jnp.float32)
    params = _init_params(kp)
    packed = pack_params(params)          # one-time, off the per-call path

    # attn_mask: causal (L, L) additive; key_padding_mask: (B, L) bool, True == padded key.
    causal = jnp.triu(jnp.full((L, L), NEG_INF, jnp.float32), k=1)
    key_padding_mask = jnp.zeros((B, L), bool).at[1, -2:].set(True)

    out, attw = self_attention_decoder_layer(x, causal, key_padding_mask, packed)
    out = jax.block_until_ready(out)
    attw = jax.block_until_ready(attw)

    ref_out, ref_attw = _reference(x, causal, key_padding_mask, params)
    assert out.shape == (B, L, D_MODEL) and attw.shape == (B, L, L)
    assert jnp.allclose(out, ref_out, rtol=2e-3, atol=2e-3)
    assert jnp.allclose(attw, ref_attw, rtol=2e-3, atol=2e-3)

    print("KERNEL_OK")
</pallas_src>

<mosaic_0001>
module attributes {stable_mosaic.version = 11 : i64} {
  func.func @_decoder_layer_kernel(%arg0: memref<16x32xf32, #tpu.memory_space<vmem>>, %arg1: memref<8x8xf32, #tpu.memory_space<vmem>>, %arg2: memref<2x8xf32, #tpu.memory_space<vmem>>, %arg3: memref<33x96xf32, #tpu.memory_space<vmem>>, %arg4: memref<33x32xf32, #tpu.memory_space<vmem>>, %arg5: memref<33x64xf32, #tpu.memory_space<vmem>>, %arg6: memref<65x32xf32, #tpu.memory_space<vmem>>, %arg7: memref<4x32xf32, #tpu.memory_space<vmem>>, %arg8: memref<16x40xf32, #tpu.memory_space<vmem>>, %arg9: memref<16x32xf32, #tpu.memory_space<vmem>>) attributes {dimension_semantics = [], scalar_prefetch = 0 : i64, scratch_operands = 1 : i64, tpu.core_type = #tpu.core_type<tc>} {
    %c0 = arith.constant 0 : index
    %c0_0 = arith.constant 0 : index
    %0 = vector.load %arg0[%c0, %c0_0] : memref<16x32xf32, #tpu.memory_space<vmem>>, vector<16x32xf32>
    %c0_1 = arith.constant 0 : index
    %c0_2 = arith.constant 0 : index
    %1 = vector.load %arg7[%c0_1, %c0_2] : memref<4x32xf32, #tpu.memory_space<vmem>>, vector<1x32xf32>
    %c1 = arith.constant 1 : index
    %c0_3 = arith.constant 0 : index
    %2 = vector.load %arg7[%c1, %c0_3] : memref<4x32xf32, #tpu.memory_space<vmem>>, vector<1x32xf32>
    %cst = arith.constant dense<0.000000e+00> : vector<16xf32>
    %3 = vector.multi_reduction <add>, %0, %cst [1] : vector<16x32xf32> to vector<16xf32>
    %4 = vector.shape_cast %3 : vector<16xf32> to vector<16x1xf32>
    %cst_4 = arith.constant 3.200000e+01 : f32
    %5 = vector.broadcast %cst_4 : f32 to vector<16x1xf32>
    %6 = arith.divf %4, %5 : vector<16x1xf32>
    %7 = vector.broadcast %6 : vector<16x1xf32> to vector<16x32xf32>
    %8 = arith.subf %0, %7 : vector<16x32xf32>
    %9 = arith.mulf %8, %8 : vector<16x32xf32>
    %cst_5 = arith.constant dense<0.000000e+00> : vector<16xf32>
    %10 = vector.multi_reduction <add>, %9, %cst_5 [1] : vector<16x32xf32> to vector<16xf32>
    %11 = vector.shape_cast %10 : vector<16xf32> to vector<16x1xf32>
    %cst_6 = arith.constant 3.200000e+01 : f32
    %12 = vector.broadcast %cst_6 : f32 to vector<16x1xf32>
    %13 = arith.divf %11, %12 : vector<16x1xf32>
    %14 = vector.broadcast %6 : vector<16x1xf32> to vector<16x32xf32>
    %15 = arith.subf %0, %14 : vector<16x32xf32>
    %cst_7 = arith.constant 9.99999974E-6 : f32
    %16 = vector.broadcast %cst_7 : f32 to vector<16x1xf32>
    %17 = arith.addf %13, %16 : vector<16x1xf32>
    %18 = math.rsqrt %17 : vector<16x1xf32>
    %19 = vector.broadcast %18 : vector<16x1xf32> to vector<16x32xf32>
    %20 = arith.mulf %15, %19 : vector<16x32xf32>
    %21 = vector.broadcast %1 : vector<1x32xf32> to vector<16x32xf32>
    %22 = arith.mulf %20, %21 : vector<16x32xf32>
    %23 = vector.broadcast %2 : vector<1x32xf32> to vector<16x32xf32>
    %24 = arith.addf %22, %23 : vector<16x32xf32>
    %c0_8 = arith.constant 0 : index
    %c0_9 = arith.constant 0 : index
    %25 = vector.load %arg3[%c0_8, %c0_9] : memref<33x96xf32, #tpu.memory_space<vmem>>, vector<32x96xf32>
    %cst_10 = arith.constant dense<0.000000e+00> : vector<16x96xf32>
    %26 = tpu.matmul %24, %25, %cst_10 {dimension_numbers = #tpu.dot_dimension_numbers<[1], [0], [0], [1], [0, 0, 1, 1], [], []>} : vector<16x32xf32>, vector<32x96xf32>, vector<16x96xf32> -> vector<16x96xf32>
    %c32 = arith.constant 32 : index
    %c0_11 = arith.constant 0 : index
    %27 = vector.load %arg3[%c32, %c0_11] : memref<33x96xf32, #tpu.memory_space<vmem>>, vector<1x96xf32>
    %28 = vector.broadcast %27 : vector<1x96xf32> to vector<16x96xf32>
    %29 = arith.addf %26, %28 : vector<16x96xf32>
    %30 = vector.extract_strided_slice %29 {offsets = [0, 0], sizes = [16, 32], strides = [1, 1]} : vector<16x96xf32> to vector<16x32xf32>
    %31 = vector.extract_strided_slice %29 {offsets = [0, 32], sizes = [16, 32], strides = [1, 1]} : vector<16x96xf32> to vector<16x32xf32>
    %32 = vector.extract_strided_slice %29 {offsets = [0, 64], sizes = [16, 32], strides = [1, 1]} : vector<16x96xf32> to vector<16x32xf32>
    %c0_12 = arith.constant 0 : index
    %c0_13 = arith.constant 0 : index
    %33 = vector.load %arg1[%c0_12, %c0_13] : memref<8x8xf32, #tpu.memory_space<vmem>>, vector<8x8xf32>
    %c0_14 = arith.constant 0 : index
    %c0_15 = arith.constant 0 : index
    %34 = vector.load %arg2[%c0_14, %c0_15] : memref<2x8xf32, #tpu.memory_space<vmem>>, vector<2x8xf32>
    %35 = vector.extract_strided_slice %30 {offsets = [0, 0], sizes = [8, 32], strides = [1, 1]} : vector<16x32xf32> to vector<8x32xf32>
    %36 = vector.extract_strided_slice %31 {offsets = [0, 0], sizes = [8, 32], strides = [1, 1]} : vector<16x32xf32> to vector<8x32xf32>
    %37 = vector.extract_strided_slice %32 {offsets = [0, 0], sizes = [8, 32], strides = [1, 1]} : vector<16x32xf32> to vector<8x32xf32>
    %38 = vector.extract_strided_slice %34 {offsets = [0, 0], sizes = [1, 8], strides = [1, 1]} : vector<2x8xf32> to vector<1x8xf32>
    %39 = vector.broadcast %38 : vector<1x8xf32> to vector<8x8xf32>
    %40 = arith.addf %33, %39 : vector<8x8xf32>
    %cst_16 = arith.constant 0.000000e+00 : f32
    %41 = vector.broadcast %cst_16 : f32 to vector<8x8xf32>
    %42 = vector.extract_strided_slice %35 {offsets = [0, 0], sizes = [8, 8], strides = [1, 1]} : vector<8x32xf32> to vector<8x8xf32>
    %43 = vector.extract_strided_slice %36 {offsets = [0, 0], sizes = [8, 8], strides = [1, 1]} : vector<8x32xf32> to vector<8x8xf32>
    %cst_17 = arith.constant dense<0.000000e+00> : vector<8x8xf32>
    %44 = tpu.matmul %42, %43, %cst_17 {dimension_numbers = #tpu.dot_dimension_numbers<[1], [1], [0], [0], [0, 0, 1, 0], [], []>} : vector<8x8xf32>, vector<8x8xf32>, vector<8x8xf32> -> vector<8x8xf32>
    %45 = arith.addf %44, %40 : vector<8x8xf32>
    %cst_18 = arith.constant dense<0xFF800000> : vector<8xf32>
    %46 = vector.multi_reduction <maximumf>, %45, %cst_18 [1] : vector<8x8xf32> to vector<8xf32>
    %47 = vector.shape_cast %46 : vector<8xf32> to vector<8x1xf32>
    %48 = vector.broadcast %47 : vector<8x1xf32> to vector<8x8xf32>
    %49 = arith.subf %45, %48 : vector<8x8xf32>
    %50 = math.exp %49 : vector<8x8xf32>
    %cst_19 = arith.constant dense<0.000000e+00> : vector<8xf32>
    %51 = vector.multi_reduction <add>, %50, %cst_19 [1] : vector<8x8xf32> to vector<8xf32>
    %52 = vector.shape_cast %51 : vector<8xf32> to vector<8x1xf32>
    %53 = tpu.reciprocal %52 {approx = true} : vector<8x1xf32> -> vector<8x1xf32>
    %54 = vector.broadcast %53 : vector<8x1xf32> to vector<8x8xf32>
    %55 = arith.mulf %50, %54 : vector<8x8xf32>
    %56 = arith.addf %41, %55 : vector<8x8xf32>
    %57 = vector.extract_strided_slice %37 {offsets = [0, 0], sizes = [8, 8], strides = [1, 1]} : vector<8x32xf32> to vector<8x8xf32>
    %cst_20 = arith.constant dense<0.000000e+00> : vector<8x8xf32>
    %58 = tpu.matmul %55, %57, %cst_20 {dimension_numbers = #tpu.dot_dimension_numbers<[1], [0], [0], [1], [0, 0, 1, 1], [], []>} : vector<8x8xf32>, vector<8x8xf32>, vector<8x8xf32> -> vector<8x8xf32>
    %c0_21 = arith.constant 0 : index
    %c0_22 = arith.constant 0 : index
    %59 = vector.load %arg9[%c0_21, %c0_22] : memref<16x32xf32, #tpu.memory_space<vmem>>, vector<8x8xf32>
    tpu.vector_store %arg9[%c0_21, %c0_22], %58 {strides = array<i32>} : memref<16x32xf32, #tpu.memory_space<vmem>>, vector<8x8xf32>,
    %60 = vector.extract_strided_slice %35 {offsets = [0, 8], sizes = [8, 8], strides = [1, 1]} : vector<8x32xf32> to vector<8x8xf32>
    %61 = vector.extract_strided_slice %36 {offsets = [0, 8], sizes = [8, 8], strides = [1, 1]} : vector<8x32xf32> to vector<8x8xf32>
    %cst_23 = arith.constant dense<0.000000e+00> : vector<8x8xf32>
    %62 = tpu.matmul %60, %61, %cst_23 {dimension_numbers = #tpu.dot_dimension_numbers<[1], [1], [0], [0], [0, 0, 1, 0], [], []>} : vector<8x8xf32>, vector<8x8xf32>, vector<8x8xf32> -> vector<8x8xf32>
    %63 = arith.addf %62, %40 : vector<8x8xf32>
    %cst_24 = arith.constant dense<0xFF800000> : vector<8xf32>
    %64 = vector.multi_reduction <maximumf>, %63, %cst_24 [1] : vector<8x8xf32> to vector<8xf32>
    %65 = vector.shape_cast %64 : vector<8xf32> to vector<8x1xf32>
    %66 = vector.broadcast %65 : vector<8x1xf32> to vector<8x8xf32>
    %67 = arith.subf %63, %66 : vector<8x8xf32>
    %68 = math.exp %67 : vector<8x8xf32>
    %cst_25 = arith.constant dense<0.000000e+00> : vector<8xf32>
    %69 = vector.multi_reduction <add>, %68, %cst_25 [1] : vector<8x8xf32> to vector<8xf32>
    %70 = vector.shape_cast %69 : vector<8xf32> to vector<8x1xf32>
    %71 = tpu.reciprocal %70 {approx = true} : vector<8x1xf32> -> vector<8x1xf32>
    %72 = vector.broadcast %71 : vector<8x1xf32> to vector<8x8xf32>
    %73 = arith.mulf %68, %72 : vector<8x8xf32>
    %74 = arith.addf %56, %73 : vector<8x8xf32>
    %75 = vector.extract_strided_slice %37 {offsets = [0, 8], sizes = [8, 8], strides = [1, 1]} : vector<8x32xf32> to vector<8x8xf32>
    %cst_26 = arith.constant dense<0.000000e+00> : vector<8x8xf32>
    %76 = tpu.matmul %73, %75, %cst_26 {dimension_numbers = #tpu.dot_dimension_numbers<[1], [0], [0], [1], [0, 0, 1, 1], [], []>} : vector<8x8xf32>, vector<8x8xf32>, vector<8x8xf32> -> vector<8x8xf32>
    %c0_27 = arith.constant 0 : index
    %c8 = arith.constant 8 : index
    %77 = vector.load %arg9[%c0_27, %c8] : memref<16x32xf32, #tpu.memory_space<vmem>>, vector<8x8xf32>
    tpu.vector_store %arg9[%c0_27, %c8], %76 {strides = array<i32>} : memref<16x32xf32, #tpu.memory_space<vmem>>, vector<8x8xf32>,
    %78 = vector.extract_strided_slice %35 {offsets = [0, 16], sizes = [8, 8], strides = [1, 1]} : vector<8x32xf32> to vector<8x8xf32>
    %79 = vector.extract_strided_slice %36 {offsets = [0, 16], sizes = [8, 8], strides = [1, 1]} : vector<8x32xf32> to vector<8x8xf32>
    %cst_28 = arith.constant dense<0.000000e+00> : vector<8x8xf32>
    %80 = tpu.matmul %78, %79, %cst_28 {dimension_numbers = #tpu.dot_dimension_numbers<[1], [1], [0], [0], [0, 0, 1, 0], [], []>} : vector<8x8xf32>, vector<8x8xf32>, vector<8x8xf32> -> vector<8x8xf32>
    %81 = arith.addf %80, %40 : vector<8x8xf32>
    %cst_29 = arith.constant dense<0xFF800000> : vector<8xf32>
    %82 = vector.multi_reduction <maximumf>, %81, %cst_29 [1] : vector<8x8xf32> to vector<8xf32>
    %83 = vector.shape_cast %82 : vector<8xf32> to vector<8x1xf32>
    %84 = vector.broadcast %83 : vector<8x1xf32> to vector<8x8xf32>
    %85 = arith.subf %81, %84 : vector<8x8xf32>
    %86 = math.exp %85 : vector<8x8xf32>
    %cst_30 = arith.constant dense<0.000000e+00> : vector<8xf32>
    %87 = vector.multi_reduction <add>, %86, %cst_30 [1] : vector<8x8xf32> to vector<8xf32>
    %88 = vector.shape_cast %87 : vector<8xf32> to vector<8x1xf32>
    %89 = tpu.reciprocal %88 {approx = true} : vector<8x1xf32> -> vector<8x1xf32>
    %90 = vector.broadcast %89 : vector<8x1xf32> to vector<8x8xf32>
    %91 = arith.mulf %86, %90 : vector<8x8xf32>
    %92 = arith.addf %74, %91 : vector<8x8xf32>
    %93 = vector.extract_strided_slice %37 {offsets = [0, 16], sizes = [8, 8], strides = [1, 1]} : vector<8x32xf32> to vector<8x8xf32>
    %cst_31 = arith.constant dense<0.000000e+00> : vector<8x8xf32>
    %94 = tpu.matmul %91, %93, %cst_31 {dimension_numbers = #tpu.dot_dimension_numbers<[1], [0], [0], [1], [0, 0, 1, 1], [], []>} : vector<8x8xf32>, vector<8x8xf32>, vector<8x8xf32> -> vector<8x8xf32>
    %c0_32 = arith.constant 0 : index
    %c16 = arith.constant 16 : index
    %95 = vector.load %arg9[%c0_32, %c16] : memref<16x32xf32, #tpu.memory_space<vmem>>, vector<8x8xf32>
    tpu.vector_store %arg9[%c0_32, %c16], %94 {strides = array<i32>} : memref<16x32xf32, #tpu.memory_space<vmem>>, vector<8x8xf32>,
    %96 = vector.extract_strided_slice %35 {offsets = [0, 24], sizes = [8, 8], strides = [1, 1]} : vector<8x32xf32> to vector<8x8xf32>
    %97 = vector.extract_strided_slice %36 {offsets = [0, 24], sizes = [8, 8], strides = [1, 1]} : vector<8x32xf32> to vector<8x8xf32>
    %cst_33 = arith.constant dense<0.000000e+00> : vector<8x8xf32>
    %98 = tpu.matmul %96, %97, %cst_33 {dimension_numbers = #tpu.dot_dimension_numbers<[1], [1], [0], [0], [0, 0, 1, 0], [], []>} : vector<8x8xf32>, vector<8x8xf32>, vector<8x8xf32> -> vector<8x8xf32>
    %99 = arith.addf %98, %40 : vector<8x8xf32>
    %cst_34 = arith.constant dense<0xFF800000> : vector<8xf32>
    %100 = vector.multi_reduction <maximumf>, %99, %cst_34 [1] : vector<8x8xf32> to vector<8xf32>
    %101 = vector.shape_cast %100 : vector<8xf32> to vector<8x1xf32>
    %102 = vector.broadcast %101 : vector<8x1xf32> to vector<8x8xf32>
    %103 = arith.subf %99, %102 : vector<8x8xf32>
    %104 = math.exp %103 : vector<8x8xf32>
    %cst_35 = arith.constant dense<0.000000e+00> : vector<8xf32>
    %105 = vector.multi_reduction <add>, %104, %cst_35 [1] : vector<8x8xf32> to vector<8xf32>
    %106 = vector.shape_cast %105 : vector<8xf32> to vector<8x1xf32>
    %107 = tpu.reciprocal %106 {approx = true} : vector<8x1xf32> -> vector<8x1xf32>
    %108 = vector.broadcast %107 : vector<8x1xf32> to vector<8x8xf32>
    %109 = arith.mulf %104, %108 : vector<8x8xf32>
    %110 = arith.addf %92, %109 : vector<8x8xf32>
    %111 = vector.extract_strided_slice %37 {offsets = [0, 24], sizes = [8, 8], strides = [1, 1]} : vector<8x32xf32> to vector<8x8xf32>
    %cst_36 = arith.constant dense<0.000000e+00> : vector<8x8xf32>
    %112 = tpu.matmul %109, %111, %cst_36 {dimension_numbers = #tpu.dot_dimension_numbers<[1], [0], [0], [1], [0, 0, 1, 1], [], []>} : vector<8x8xf32>, vector<8x8xf32>, vector<8x8xf32> -> vector<8x8xf32>
    %c0_37 = arith.constant 0 : index
    %c24 = arith.constant 24 : index
    %113 = vector.load %arg9[%c0_37, %c24] : memref<16x32xf32, #tpu.memory_space<vmem>>, vector<8x8xf32>
    tpu.vector_store %arg9[%c0_37, %c24], %112 {strides = array<i32>} : memref<16x32xf32, #tpu.memory_space<vmem>>, vector<8x8xf32>,
    %cst_38 = arith.constant 2.500000e-01 : f32
    %114 = vector.broadcast %cst_38 : f32 to vector<8x8xf32>
    %115 = arith.mulf %110, %114 : vector<8x8xf32>
    %c0_39 = arith.constant 0 : index
    %c32_40 = arith.constant 32 : index
    %116 = vector.load %arg8[%c0_39, %c32_40] : memref<16x40xf32, #tpu.memory_space<vmem>>, vector<8x8xf32>
    tpu.vector_store %arg8[%c0_39, %c32_40], %115 {strides = array<i32>} : memref<16x40xf32, #tpu.memory_space<vmem>>, vector<8x8xf32>,
    %117 = vector.extract_strided_slice %30 {offsets = [8, 0], sizes = [8, 32], strides = [1, 1]} : vector<16x32xf32> to vector<8x32xf32>
    %118 = vector.extract_strided_slice %31 {offsets = [8, 0], sizes = [8, 32], strides = [1, 1]} : vector<16x32xf32> to vector<8x32xf32>
    %119 = vector.extract_strided_slice %32 {offsets = [8, 0], sizes = [8, 32], strides = [1, 1]} : vector<16x32xf32> to vector<8x32xf32>
    %120 = vector.extract_strided_slice %34 {offsets = [1, 0], sizes = [1, 8], strides = [1, 1]} : vector<2x8xf32> to vector<1x8xf32>
    %121 = vector.broadcast %120 : vector<1x8xf32> to vector<8x8xf32>
    %122 = arith.addf %33, %121 : vector<8x8xf32>
    %cst_41 = arith.constant 0.000000e+00 : f32
    %123 = vector.broadcast %cst_41 : f32 to vector<8x8xf32>
    %124 = vector.extract_strided_slice %117 {offsets = [0, 0], sizes = [8, 8], strides = [1, 1]} : vector<8x32xf32> to vector<8x8xf32>
    %125 = vector.extract_strided_slice %118 {offsets = [0, 0], sizes = [8, 8], strides = [1, 1]} : vector<8x32xf32> to vector<8x8xf32>
    %cst_42 = arith.constant dense<0.000000e+00> : vector<8x8xf32>
    %126 = tpu.matmul %124, %125, %cst_42 {dimension_numbers = #tpu.dot_dimension_numbers<[1], [1], [0], [0], [0, 0, 1, 0], [], []>} : vector<8x8xf32>, vector<8x8xf32>, vector<8x8xf32> -> vector<8x8xf32>
    %127 = arith.addf %126, %122 : vector<8x8xf32>
    %cst_43 = arith.constant dense<0xFF800000> : vector<8xf32>
    %128 = vector.multi_reduction <maximumf>, %127, %cst_43 [1] : vector<8x8xf32> to vector<8xf32>
    %129 = vector.shape_cast %128 : vector<8xf32> to vector<8x1xf32>
    %130 = vector.broadcast %129 : vector<8x1xf32> to vector<8x8xf32>
    %131 = arith.subf %127, %130 : vector<8x8xf32>
    %132 = math.exp %131 : vector<8x8xf32>
    %cst_44 = arith.constant dense<0.000000e+00> : vector<8xf32>
    %133 = vector.multi_reduction <add>, %132, %cst_44 [1] : vector<8x8xf32> to vector<8xf32>
    %134 = vector.shape_cast %133 : vector<8xf32> to vector<8x1xf32>
    %135 = tpu.reciprocal %134 {approx = true} : vector<8x1xf32> -> vector<8x1xf32>
    %136 = vector.broadcast %135 : vector<8x1xf32> to vector<8x8xf32>
    %137 = arith.mulf %132, %136 : vector<8x8xf32>
    %138 = arith.addf %123, %137 : vector<8x8xf32>
    %139 = vector.extract_strided_slice %119 {offsets = [0, 0], sizes = [8, 8], strides = [1, 1]} : vector<8x32xf32> to vector<8x8xf32>
    %cst_45 = arith.constant dense<0.000000e+00> : vector<8x8xf32>
    %140 = tpu.matmul %137, %139, %cst_45 {dimension_numbers = #tpu.dot_dimension_numbers<[1], [0], [0], [1], [0, 0, 1, 1], [], []>} : vector<8x8xf32>, vector<8x8xf32>, vector<8x8xf32> -> vector<8x8xf32>
    %c8_46 = arith.constant 8 : index
    %c0_47 = arith.constant 0 : index
    %141 = vector.load %arg9[%c8_46, %c0_47] : memref<16x32xf32, #tpu.memory_space<vmem>>, vector<8x8xf32>
    tpu.vector_store %arg9[%c8_46, %c0_47], %140 {strides = array<i32>} : memref<16x32xf32, #tpu.memory_space<vmem>>, vector<8x8xf32>,
    %142 = vector.extract_strided_slice %117 {offsets = [0, 8], sizes = [8, 8], strides = [1, 1]} : vector<8x32xf32> to vector<8x8xf32>
    %143 = vector.extract_strided_slice %118 {offsets = [0, 8], sizes = [8, 8], strides = [1, 1]} : vector<8x32xf32> to vector<8x8xf32>
    %cst_48 = arith.constant dense<0.000000e+00> : vector<8x8xf32>
    %144 = tpu.matmul %142, %143, %cst_48 {dimension_numbers = #tpu.dot_dimension_numbers<[1], [1], [0], [0], [0, 0, 1, 0], [], []>} : vector<8x8xf32>, vector<8x8xf32>, vector<8x8xf32> -> vector<8x8xf32>
    %145 = arith.addf %144, %122 : vector<8x8xf32>
    %cst_49 = arith.constant dense<0xFF800000> : vector<8xf32>
    %146 = vector.multi_reduction <maximumf>, %145, %cst_49 [1] : vector<8x8xf32> to vector<8xf32>
    %147 = vector.shape_cast %146 : vector<8xf32> to vector<8x1xf32>
    %148 = vector.broadcast %147 : vector<8x1xf32> to vector<8x8xf32>
    %149 = arith.subf %145, %148 : vector<8x8xf32>
    %150 = math.exp %149 : vector<8x8xf32>
    %cst_50 = arith.constant dense<0.000000e+00> : vector<8xf32>
    %151 = vector.multi_reduction <add>, %150, %cst_50 [1] : vector<8x8xf32> to vector<8xf32>
    %152 = vector.shape_cast %151 : vector<8xf32> to vector<8x1xf32>
    %153 = tpu.reciprocal %152 {approx = true} : vector<8x1xf32> -> vector<8x1xf32>
    %154 = vector.broadcast %153 : vector<8x1xf32> to vector<8x8xf32>
    %155 = arith.mulf %150, %154 : vector<8x8xf32>
    %156 = arith.addf %138, %155 : vector<8x8xf32>
    %157 = vector.extract_strided_slice %119 {offsets = [0, 8], sizes = [8, 8], strides = [1, 1]} : vector<8x32xf32> to vector<8x8xf32>
    %cst_51 = arith.constant dense<0.000000e+00> : vector<8x8xf32>
    %158 = tpu.matmul %155, %157, %cst_51 {dimension_numbers = #tpu.dot_dimension_numbers<[1], [0], [0], [1], [0, 0, 1, 1], [], []>} : vector<8x8xf32>, vector<8x8xf32>, vector<8x8xf32> -> vector<8x8xf32>
    %c8_52 = arith.constant 8 : index
    %c8_53 = arith.constant 8 : index
    %159 = vector.load %arg9[%c8_52, %c8_53] : memref<16x32xf32, #tpu.memory_space<vmem>>, vector<8x8xf32>
    tpu.vector_store %arg9[%c8_52, %c8_53], %158 {strides = array<i32>} : memref<16x32xf32, #tpu.memory_space<vmem>>, vector<8x8xf32>,
    %160 = vector.extract_strided_slice %117 {offsets = [0, 16], sizes = [8, 8], strides = [1, 1]} : vector<8x32xf32> to vector<8x8xf32>
    %161 = vector.extract_strided_slice %118 {offsets = [0, 16], sizes = [8, 8], strides = [1, 1]} : vector<8x32xf32> to vector<8x8xf32>
    %cst_54 = arith.constant dense<0.000000e+00> : vector<8x8xf32>
    %162 = tpu.matmul %160, %161, %cst_54 {dimension_numbers = #tpu.dot_dimension_numbers<[1], [1], [0], [0], [0, 0, 1, 0], [], []>} : vector<8x8xf32>, vector<8x8xf32>, vector<8x8xf32> -> vector<8x8xf32>
    %163 = arith.addf %162, %122 : vector<8x8xf32>
    %cst_55 = arith.constant dense<0xFF800000> : vector<8xf32>
    %164 = vector.multi_reduction <maximumf>, %163, %cst_55 [1] : vector<8x8xf32> to vector<8xf32>
    %165 = vector.shape_cast %164 : vector<8xf32> to vector<8x1xf32>
    %166 = vector.broadcast %165 : vector<8x1xf32> to vector<8x8xf32>
    %167 = arith.subf %163, %166 : vector<8x8xf32>
    %168 = math.exp %167 : vector<8x8xf32>
    %cst_56 = arith.constant dense<0.000000e+00> : vector<8xf32>
    %169 = vector.multi_reduction <add>, %168, %cst_56 [1] : vector<8x8xf32> to vector<8xf32>
    %170 = vector.shape_cast %169 : vector<8xf32> to vector<8x1xf32>
    %171 = tpu.reciprocal %170 {approx = true} : vector<8x1xf32> -> vector<8x1xf32>
    %172 = vector.broadcast %171 : vector<8x1xf32> to vector<8x8xf32>
    %173 = arith.mulf %168, %172 : vector<8x8xf32>
    %174 = arith.addf %156, %173 : vector<8x8xf32>
    %175 = vector.extract_strided_slice %119 {offsets = [0, 16], sizes = [8, 8], strides = [1, 1]} : vector<8x32xf32> to vector<8x8xf32>
    %cst_57 = arith.constant dense<0.000000e+00> : vector<8x8xf32>
    %176 = tpu.matmul %173, %175, %cst_57 {dimension_numbers = #tpu.dot_dimension_numbers<[1], [0], [0], [1], [0, 0, 1, 1], [], []>} : vector<8x8xf32>, vector<8x8xf32>, vector<8x8xf32> -> vector<8x8xf32>
    %c8_58 = arith.constant 8 : index
    %c16_59 = arith.constant 16 : index
    %177 = vector.load %arg9[%c8_58, %c16_59] : memref<16x32xf32, #tpu.memory_space<vmem>>, vector<8x8xf32>
    tpu.vector_store %arg9[%c8_58, %c16_59], %176 {strides = array<i32>} : memref<16x32xf32, #tpu.memory_space<vmem>>, vector<8x8xf32>,
    %178 = vector.extract_strided_slice %117 {offsets = [0, 24], sizes = [8, 8], strides = [1, 1]} : vector<8x32xf32> to vector<8x8xf32>
    %179 = vector.extract_strided_slice %118 {offsets = [0, 24], sizes = [8, 8], strides = [1, 1]} : vector<8x32xf32> to vector<8x8xf32>
    %cst_60 = arith.constant dense<0.000000e+00> : vector<8x8xf32>
    %180 = tpu.matmul %178, %179, %cst_60 {dimension_numbers = #tpu.dot_dimension_numbers<[1], [1], [0], [0], [0, 0, 1, 0], [], []>} : vector<8x8xf32>, vector<8x8xf32>, vector<8x8xf32> -> vector<8x8xf32>
    %181 = arith.addf %180, %122 : vector<8x8xf32>
    %cst_61 = arith.constant dense<0xFF800000> : vector<8xf32>
    %182 = vector.multi_reduction <maximumf>, %181, %cst_61 [1] : vector<8x8xf32> to vector<8xf32>
    %183 = vector.shape_cast %182 : vector<8xf32> to vector<8x1xf32>
    %184 = vector.broadcast %183 : vector<8x1xf32> to vector<8x8xf32>
    %185 = arith.subf %181, %184 : vector<8x8xf32>
    %186 = math.exp %185 : vector<8x8xf32>
    %cst_62 = arith.constant dense<0.000000e+00> : vector<8xf32>
    %187 = vector.multi_reduction <add>, %186, %cst_62 [1] : vector<8x8xf32> to vector<8xf32>
    %188 = vector.shape_cast %187 : vector<8xf32> to vector<8x1xf32>
    %189 = tpu.reciprocal %188 {approx = true} : vector<8x1xf32> -> vector<8x1xf32>
    %190 = vector.broadcast %189 : vector<8x1xf32> to vector<8x8xf32>
    %191 = arith.mulf %186, %190 : vector<8x8xf32>
    %192 = arith.addf %174, %191 : vector<8x8xf32>
    %193 = vector.extract_strided_slice %119 {offsets = [0, 24], sizes = [8, 8], strides = [1, 1]} : vector<8x32xf32> to vector<8x8xf32>
    %cst_63 = arith.constant dense<0.000000e+00> : vector<8x8xf32>
    %194 = tpu.matmul %191, %193, %cst_63 {dimension_numbers = #tpu.dot_dimension_numbers<[1], [0], [0], [1], [0, 0, 1, 1], [], []>} : vector<8x8xf32>, vector<8x8xf32>, vector<8x8xf32> -> vector<8x8xf32>
    %c8_64 = arith.constant 8 : index
    %c24_65 = arith.constant 24 : index
    %195 = vector.load %arg9[%c8_64, %c24_65] : memref<16x32xf32, #tpu.memory_space<vmem>>, vector<8x8xf32>
    tpu.vector_store %arg9[%c8_64, %c24_65], %194 {strides = array<i32>} : memref<16x32xf32, #tpu.memory_space<vmem>>, vector<8x8xf32>,
    %cst_66 = arith.constant 2.500000e-01 : f32
    %196 = vector.broadcast %cst_66 : f32 to vector<8x8xf32>
    %197 = arith.mulf %192, %196 : vector<8x8xf32>
    %c8_67 = arith.constant 8 : index
    %c32_68 = arith.constant 32 : index
    %198 = vector.load %arg8[%c8_67, %c32_68] : memref<16x40xf32, #tpu.memory_space<vmem>>, vector<8x8xf32>
    tpu.vector_store %arg8[%c8_67, %c32_68], %197 {strides = array<i32>} : memref<16x40xf32, #tpu.memory_space<vmem>>, vector<8x8xf32>,
    %c0_69 = arith.constant 0 : index
    %c0_70 = arith.constant 0 : index
    %199 = vector.load %arg9[%c0_69, %c0_70] : memref<16x32xf32, #tpu.memory_space<vmem>>, vector<16x32xf32>
    %c0_71 = arith.constant 0 : index
    %c0_72 = arith.constant 0 : index
    %200 = vector.load %arg4[%c0_71, %c0_72] : memref<33x32xf32, #tpu.memory_space<vmem>>, vector<32x32xf32>
    %cst_73 = arith.constant dense<0.000000e+00> : vector<16x32xf32>
    %201 = tpu.matmul %199, %200, %cst_73 {dimension_numbers = #tpu.dot_dimension_numbers<[1], [0], [0], [1], [0, 0, 1, 1], [], []>} : vector<16x32xf32>, vector<32x32xf32>, vector<16x32xf32> -> vector<16x32xf32>
    %c32_74 = arith.constant 32 : index
    %c0_75 = arith.constant 0 : index
    %202 = vector.load %arg4[%c32_74, %c0_75] : memref<33x32xf32, #tpu.memory_space<vmem>>, vector<1x32xf32>
    %203 = vector.broadcast %202 : vector<1x32xf32> to vector<16x32xf32>
    %204 = arith.addf %201, %203 : vector<16x32xf32>
    %205 = arith.addf %0, %204 : vector<16x32xf32>
    %c2 = arith.constant 2 : index
    %c0_76 = arith.constant 0 : index
    %206 = vector.load %arg7[%c2, %c0_76] : memref<4x32xf32, #tpu.memory_space<vmem>>, vector<1x32xf32>
    %c3 = arith.constant 3 : index
    %c0_77 = arith.constant 0 : index
    %207 = vector.load %arg7[%c3, %c0_77] : memref<4x32xf32, #tpu.memory_space<vmem>>, vector<1x32xf32>
    %cst_78 = arith.constant dense<0.000000e+00> : vector<16xf32>
    %208 = vector.multi_reduction <add>, %205, %cst_78 [1] : vector<16x32xf32> to vector<16xf32>
    %209 = vector.shape_cast %208 : vector<16xf32> to vector<16x1xf32>
    %cst_79 = arith.constant 3.200000e+01 : f32
    %210 = vector.broadcast %cst_79 : f32 to vector<16x1xf32>
    %211 = arith.divf %209, %210 : vector<16x1xf32>
    %212 = vector.broadcast %211 : vector<16x1xf32> to vector<16x32xf32>
    %213 = arith.subf %205, %212 : vector<16x32xf32>
    %214 = arith.mulf %213, %213 : vector<16x32xf32>
    %cst_80 = arith.constant dense<0.000000e+00> : vector<16xf32>
    %215 = vector.multi_reduction <add>, %214, %cst_80 [1] : vector<16x32xf32> to vector<16xf32>
    %216 = vector.shape_cast %215 : vector<16xf32> to vector<16x1xf32>
    %cst_81 = arith.constant 3.200000e+01 : f32
    %217 = vector.broadcast %cst_81 : f32 to vector<16x1xf32>
    %218 = arith.divf %216, %217 : vector<16x1xf32>
    %219 = vector.broadcast %211 : vector<16x1xf32> to vector<16x32xf32>
    %220 = arith.subf %205, %219 : vector<16x32xf32>
    %cst_82 = arith.constant 9.99999974E-6 : f32
    %221 = vector.broadcast %cst_82 : f32 to vector<16x1xf32>
    %222 = arith.addf %218, %221 : vector<16x1xf32>
    %223 = math.rsqrt %222 : vector<16x1xf32>
    %224 = vector.broadcast %223 : vector<16x1xf32> to vector<16x32xf32>
    %225 = arith.mulf %220, %224 : vector<16x32xf32>
    %226 = vector.broadcast %206 : vector<1x32xf32> to vector<16x32xf32>
    %227 = arith.mulf %225, %226 : vector<16x32xf32>
    %228 = vector.broadcast %207 : vector<1x32xf32> to vector<16x32xf32>
    %229 = arith.addf %227, %228 : vector<16x32xf32>
    %c0_83 = arith.constant 0 : index
    %c0_84 = arith.constant 0 : index
    %230 = vector.load %arg5[%c0_83, %c0_84] : memref<33x64xf32, #tpu.memory_space<vmem>>, vector<32x64xf32>
    %cst_85 = arith.constant dense<0.000000e+00> : vector<16x64xf32>
    %231 = tpu.matmul %229, %230, %cst_85 {dimension_numbers = #tpu.dot_dimension_numbers<[1], [0], [0], [1], [0, 0, 1, 1], [], []>} : vector<16x32xf32>, vector<32x64xf32>, vector<16x64xf32> -> vector<16x64xf32>
    %c32_86 = arith.constant 32 : index
    %c0_87 = arith.constant 0 : index
    %232 = vector.load %arg5[%c32_86, %c0_87] : memref<33x64xf32, #tpu.memory_space<vmem>>, vector<1x64xf32>
    %233 = vector.broadcast %232 : vector<1x64xf32> to vector<16x64xf32>
    %234 = arith.addf %231, %233 : vector<16x64xf32>
    %235 = arith.mulf %234, %234 : vector<16x64xf32>
    %236 = arith.mulf %234, %235 : vector<16x64xf32>
    %cst_88 = arith.constant 4.471500e-02 : f32
    %237 = vector.broadcast %cst_88 : f32 to vector<16x64xf32>
    %238 = arith.mulf %237, %236 : vector<16x64xf32>
    %239 = arith.addf %234, %238 : vector<16x64xf32>
    %cst_89 = arith.constant 0.797884583 : f32
    %240 = vector.broadcast %cst_89 : f32 to vector<16x64xf32>
    %241 = arith.mulf %240, %239 : vector<16x64xf32>
    %242 = math.tanh %241 : vector<16x64xf32>
    %cst_90 = arith.constant 1.000000e+00 : f32
    %243 = vector.broadcast %cst_90 : f32 to vector<16x64xf32>
    %244 = arith.addf %243, %242 : vector<16x64xf32>
    %cst_91 = arith.constant 5.000000e-01 : f32
    %245 = vector.broadcast %cst_91 : f32 to vector<16x64xf32>
    %246 = arith.mulf %245, %244 : vector<16x64xf32>
    %247 = arith.mulf %234, %246 : vector<16x64xf32>
    %c0_92 = arith.constant 0 : index
    %c0_93 = arith.constant 0 : index
    %248 = vector.load %arg6[%c0_92, %c0_93] : memref<65x32xf32, #tpu.memory_space<vmem>>, vector<64x32xf32>
    %cst_94 = arith.constant dense<0.000000e+00> : vector<16x32xf32>
    %249 = tpu.matmul %247, %248, %cst_94 {dimension_numbers = #tpu.dot_dimension_numbers<[1], [0], [0], [1], [0, 0, 1, 1], [], []>} : vector<16x64xf32>, vector<64x32xf32>, vector<16x32xf32> -> vector<16x32xf32>
    %c64 = arith.constant 64 : index
    %c0_95 = arith.constant 0 : index
    %250 = vector.load %arg6[%c64, %c0_95] : memref<65x32xf32, #tpu.memory_space<vmem>>, vector<1x32xf32>
    %251 = vector.broadcast %250 : vector<1x32xf32> to vector<16x32xf32>
    %252 = arith.addf %249, %251 : vector<16x32xf32>
    %c0_96 = arith.constant 0 : index
    %c0_97 = arith.constant 0 : index
    %253 = vector.load %arg8[%c0_96, %c0_97] : memref<16x40xf32, #tpu.memory_space<vmem>>, vector<16x32xf32>
    tpu.vector_store %arg8[%c0_96, %c0_97], %252 {strides = array<i32>} : memref<16x40xf32, #tpu.memory_space<vmem>>, vector<16x32xf32>,
    return
  }
}

</mosaic_0001>

<bundles_post_ra>
// kernel: self_attention_decoder_layer.1
= control target key start
LH: loop header
LB: loop body
LE: loop exit
PB: predicated region body
PF: predicated region fallthrough
CT: control target
= control target key end

     0   :  { %vm33_vm0 = vcmask 261120   ;;  %v2226_v36 = vmov 0.0   ;;  %vm2227_vm1 = vmmov 0   ;;  %s2228_s22 = smov 88   ;;  %s2229_s23 = smov 96   ;;  %vm173_vm2 = vcmask 64512   ;;  %s2576_s0 = inlined_call_operand.vmem [shape: f32[16,32], index: 0, kind: input, shape index: {}]   ;;  %s2577_s3 = inlined_call_operand.vmem [shape: f32[33,96], index: 3, kind: input, shape index: {}]   ;;  %s2578_s7 = inlined_call_operand.vmem [shape: f32[4,32], index: 7, kind: input, shape index: {}]   ;;  %s2579_s2 = inlined_call_operand.vmem [shape: f32[2,8], index: 2, kind: input, shape index: {}]   ;;  %s2580_s1 = inlined_call_operand.vmem [shape: f32[8,8], index: 1, kind: input, shape index: {}]   ;;  %s2581_s4 = inlined_call_operand.vmem [shape: f32[33,32], index: 4, kind: input, shape index: {}]   ;;  %s2582_s8 = inlined_call_operand.vmem [shape: f32[16,40], index: 8, kind: output, shape index: {}]   ;;  %s2583_s5 = inlined_call_operand.vmem [shape: f32[33,64], index: 5, kind: input, shape index: {}]   ;;  %s2584_s6 = inlined_call_operand.vmem [shape: f32[65,32], index: 6, kind: input, shape index: {}]  }
   0x1   :  { %v2291_v0 = vld [vmem:[%s2576_s0] sm:$0xff]  ;;  %v2296_v1 = vld [vmem:[%s2576_s0 + $0x8] sm:$0xff]  ;;  %v75_v16 = vld [vmem:[%s2577_s3 + $0x10] sm:$0xff]  ;;  %2014 = vmatprep.subr.mxu0 %v2226_v36  ;;  %2016 = vmatprep.mubr.msk.f32.mxu0 %vm2227_vm1, %v2226_v36  ;;  %s2230_s24 = smov 120   ;;  %s2231_s25 = smov 112   ;;  %v165_v56 = vlaneseq  ;;  %vm507_vm3 = vcmask 130112  }
   0x2   :  { %v34_v2 = vsel %vm33_vm0, %v2291_v0, 0.0  ;;  %v37_v3 = vsel %vm33_vm0, %v2296_v1, 0.0  ;;  %v73_v14 = vld [vmem:[%s2577_s3] sm:$0xff]  ;;  %v74_v15 = vld [vmem:[%s2577_s3 + $0x8] sm:$0xff]  ;;  %v76_v18 = vld [vmem:[%s2577_s3 + $0x18] sm:$0xff]  ;;  %s2232_s26 = smov 80  }
   0x3   :  { %35 = vadd.xlane.f32.xlu0 %v34_v2  ;;  %v2125_v17 = vpack.c.bf16 %v74_v15, %v73_v14  ;;  %v2129_v19 = vpack.c.bf16 %v76_v18, %v75_v16  ;;  %v1893_v27 = vld [vmem:[%s2578_s7] ss:$0 sm:$0xff]  ;;  %v1894_v29 = vld [vmem:[%s2578_s7 + $0x1] ss:$0 sm:$0xff]  ;;  %s2234_s27 = smov 72   ;;  %v166_v57 = vshrl.u32 %v165_v56, 7 }
   0x4   :  { %v1895_v37 = vld [vmem:[%s2577_s3 + $0x20] ss:$0 sm:$0xff]  ;;  %s2233_s3 = smov 104   ;;  %s2237_s9 = smov 40   ;;  %vm679_vm4 = vcmask 195712   ;;  %vm851_vm5 = vcmask 261312  }
   0x5   :  { %2126 = vmatprep.subr.bf16.mxu1 %v2125_v17  ;;  %v167_v58 = vsub.s32 0, %v166_v57  ;;  %v164_v59 = vld [vmem:[%s2579_s2] sm:$0x3]  ;;  %s2236_s2 = smov 48   ;;  %s2238_s10 = smov 56   ;;  %vm858_vm6 = vcmask 326912  }
   0x6   :  { %2128 = vmatpush3.bf16.msra.mxu1 %v2125_v17  ;;  %v163_v61 = vld [vmem:[%s2580_s1] sm:$0xff]  ;;  %s2235_s1 = smov 64   ;;  %s2239_s11 = smov 8   ;;  %vm1805_vm7 = vcmask 523264  }
   0x7   :  { %38 = vadd.xlane.f32.xlu0 %v37_v3  ;;  %2130 = vmatprep.subr.bf16.mxu1 %v2129_v19  ;;  %v168_v60 = vrot.slane %v164_v59, %v167_v58  ;;  %s2240_s12 = smov 16   ;;  %s2241_s13 = smov 24  }
   0x9   :  { %v169_v62 = vadd.f32 %v168_v60, %v163_v61 }
   0xa   :  { %2132 = vmatpush3.bf16.msra.mxu1 %v2129_v19 }
   0xb   :  { %2004 = vmatprep.subr.mxu1 %v2226_v36 }
  0x90   :  { %v36_v4 = vpop.xlane.xlu0 %35 }
  0x91   :  { %v41_v5 = vmul.f32 0.03125, %v36_v4 }
  0x93   :  { %v43_v6 = vsub.f32 %v2291_v0, %v41_v5 }
  0x94   :  { %v39_v7 = vpop.xlane.xlu0 %38 }
  0x95   :  { %v42_v8 = vmul.f32 0.03125, %v39_v7  ;;  %v45_v9 = vmul.f32 %v43_v6, %v43_v6 }
  0x97   :  { %v44_v10 = vsub.f32 %v2296_v1, %v42_v8  ;;  %v47_v11 = vsel %vm33_vm0, %v45_v9, 0.0  ;;  %v862_v9 = vsub.s32 1, %v166_v57 }
  0x98   :  { %48 = vadd.xlane.f32.xlu1 %v47_v11 }
  0x99   :  { %v46_v12 = vmul.f32 %v44_v10, %v44_v10 }
  0x9b   :  { %v50_v13 = vsel %vm33_vm0, %v46_v12, 0.0 }
  0x9c   :  { %51 = vadd.xlane.f32.xlu1 %v50_v13  ;;  %v863_v13 = vrot.slane %v164_v59, %v862_v9 }
  0x9e   :  { %v864_v18 = vadd.f32 %v863_v13, %v163_v61 }
 0x125   :  { %v49_v20 = vpop.xlane.xlu1 %48 }
 0x126   :  { %v53_v21 = vmul.f32 0.03125, %v49_v20 }
 0x128   :  { %v55_v22 = vadd.f32 1e-05, %v53_v21 }
 0x129   :  { %v52_v23 = vpop.xlane.xlu1 %51 }
 0x12a   :  { %2182 = vrsqrt.f32 %v55_v22  ;;  %v54_v24 = vmul.f32 0.03125, %v52_v23 }
 0x12c   :  { %v56_v25 = vadd.f32 1e-05, %v54_v24 }
 0x12e   :  { %2184 = vrsqrt.f32 %v56_v25 }
 0x134   :  { %v2183_v26 = vpop.eup %2182 }
 0x135   :  { %v59_v28 = vmul.f32 %v2183_v26, %v43_v6 }
 0x137   :  { %v65_v30 = vmul.f32 %v1893_v27, %v59_v28 }
 0x138   :  { %v2185_v31 = vpop.eup %2184 }
 0x139   :  { %v60_v32 = vmul.f32 %v2185_v31, %v44_v10  ;;  %v71_v33 = vadd.f32 %v1894_v29, %v65_v30 }
 0x13b   :  { %v66_v34 = vmul.f32 %v1893_v27, %v60_v32  ;;  %2001 = vmatprep.mubr.msk.f32.mxu1 %vm33_vm0, %v71_v33 }
 0x13d   :  { %v72_v35 = vadd.f32 %v1894_v29, %v66_v34 }
 0x13f   :  { %2002 = vmatmul.mubr.msk.f32.vlgmr.msra.gmra.mrb[0].mxu1 %vm33_vm0, %v72_v35 }
 0x140   :  { %2006 = vmatprep.mubr.msk.f32.mxu1 %vm2227_vm1, %v2226_v36 }
 0x212   :  { %v2003_v38 = vpop.f32.mrb[0].mxu1 }
 0x213   :  { %v154_v39 = vpop.f32.mrb[1].mxu1  ;;  %v2343_v41 = vadd.f32 %v2003_v38, %v1895_v37 }
 0x214   :  { %v2335_v40 = vadd.f32 %v1895_v37, %v154_v39 }
 0x216   :  { %339 = vrot.lane.b32.xlu1 %v2335_v40, %s2228_s22  ;;  %171 = vrot.lane.b32.xlu0 %v2335_v40, %s2229_s23 }
 0x21a   :  { %337 = vrot.lane.b32.xlu1 %v2335_v40, %s2230_s24  ;;  %509 = vrot.lane.b32.xlu0 %v2335_v40, %s2231_s25 }
 0x21e   :  { %511 = vrot.lane.b32.xlu1 %v2335_v40, %s2232_s26  ;;  %681 = vrot.lane.b32.xlu0 %v2335_v40, %s2233_s3 }
 0x222   :  { %683 = vrot.lane.b32.xlu1 %v2335_v40, %s2234_s27  ;;  %1033 = vrot.lane.b32.xlu0 %v2343_v41, %s2228_s22 }
 0x226   :  { %866 = vrot.lane.b32.xlu1 %v2343_v41, %s2229_s23  ;;  %1204 = vrot.lane.b32.xlu0 %v2343_v41, %s2232_s26 }
 0x22a   :  { %1031 = vrot.lane.b32.xlu1 %v2343_v41, %s2230_s24  ;;  %1375 = vrot.lane.b32.xlu0 %v2343_v41, %s2234_s27  ;;  %s2242_s24 = smov 32  }
 0x22e   :  { %1202 = vrot.lane.b32.xlu1 %v2343_v41, %s2231_s25 }
 0x232   :  { %1373 = vrot.lane.b32.xlu1 %v2343_v41, %s2233_s3 }
 0x288   :  { %v340_v42 = vpop.permute.xlu1 %339  ;;  %v172_v43 = vpop.permute.xlu0 %171 }
 0x289   :  { %2005 = vmatpush3.xpose.msk.msra.mxu1 %vm173_vm2, %v172_v43  ;;  %2015 = vmatpush3.xpose.msk.msra.mxu0 %vm173_vm2, %v340_v42 }
 0x28a   :  { %2024 = vmatprep.subr.mxu0 %v2226_v36  ;;  %2009 = vmatprep.subr.mxu1 %v2226_v36 }
 0x28c   :  { %v338_v44 = vpop.permute.xlu1 %337  ;;  %2007 = vmatmul.mubr.msk.f32.vlgmr.msra.gmra.mrb[2].mxu1 %vm173_vm2, %v2335_v40  ;;  %v510_v45 = vpop.permute.xlu0 %509 }
 0x28d   :  { %2017 = vmatmul.mubr.msk.f32.vlgmr.msra.gmra.mrb[0].mxu0 %vm173_vm2, %v338_v44  ;;  %2011 = vmatprep.mubr.msk.f32.mxu1 %vm2227_vm1, %v2226_v36 }
 0x28e   :  { %2026 = vmatprep.mubr.msk.f32.mxu0 %vm2227_vm1, %v2226_v36 }
 0x290   :  { %v512_v46 = vpop.permute.xlu1 %511  ;;  %v682_v47 = vpop.permute.xlu0 %681 }
 0x291   :  { %2025 = vmatpush3.xpose.msk.msra.mxu0 %vm173_vm2, %v512_v46 }
 0x292   :  { %2034 = vmatprep.subr.mxu0 %v2226_v36 }
 0x294   :  { %v684_v48 = vpop.permute.xlu1 %683  ;;  %2027 = vmatmul.mubr.msk.f32.vlgmr.msra.gmra.mrb[2].mxu0 %vm173_vm2, %v510_v45  ;;  %v1034_v49 = vpop.permute.xlu0 %1033 }
 0x295   :  { %2035 = vmatpush3.xpose.msk.msra.mxu0 %vm173_vm2, %v684_v48  ;;  %2036 = vmatprep.mubr.msk.f32.mxu0 %vm2227_vm1, %v2226_v36 }
 0x296   :  { %2044 = vmatprep.subr.mxu0 %v2226_v36 }
 0x298   :  { %v867_v50 = vpop.permute.xlu1 %866  ;;  %2037 = vmatmul.mubr.msk.f32.vlgmr.msra.gmra.mrb[4].mxu0 %vm173_vm2, %v682_v47  ;;  %v1205_v52 = vpop.permute.xlu0 %1204 }
 0x299   :  { %2045 = vmatpush3.xpose.msk.msra.mxu0 %vm173_vm2, %v867_v50  ;;  %2046 = vmatprep.mubr.msk.f32.mxu0 %vm2227_vm1, %v2226_v36 }
 0x29a   :  { %2054 = vmatprep.subr.mxu0 %v2226_v36 }
 0x29c   :  { %v1032_v51 = vpop.permute.xlu1 %1031  ;;  %2047 = vmatmul.mubr.msk.f32.vlgmr.msra.gmra.mrb[6].mxu0 %vm173_vm2, %v2343_v41  ;;  %v1376_v54 = vpop.permute.xlu0 %1375 }
 0x29d   :  { %2055 = vmatpush3.xpose.msk.msra.mxu0 %vm173_vm2, %v1034_v49  ;;  %2056 = vmatprep.mubr.msk.f32.mxu0 %vm2227_vm1, %v2226_v36 }
 0x29e   :  { %2064 = vmatprep.subr.mxu0 %v2226_v36 }
 0x2a0   :  { %2057 = vmatmul.mubr.msk.f32.vlgmr.msra.gmra.mrb[8].mxu0 %vm173_vm2, %v1032_v51  ;;  %v1203_v53 = vpop.permute.xlu1 %1202 }
 0x2a1   :  { %2065 = vmatpush3.xpose.msk.msra.mxu0 %vm173_vm2, %v1205_v52  ;;  %2066 = vmatprep.mubr.msk.f32.mxu0 %vm2227_vm1, %v2226_v36 }
 0x2a2   :  { %2074 = vmatprep.subr.mxu0 %v2226_v36 }
 0x2a4   :  { %2067 = vmatmul.mubr.msk.f32.vlgmr.msra.gmra.mrb[10].mxu0 %vm173_vm2, %v1203_v53  ;;  %v1374_v55 = vpop.permute.xlu1 %1373 }
 0x2a5   :  { %2075 = vmatpush3.xpose.msk.msra.mxu0 %vm173_vm2, %v1376_v54  ;;  %2076 = vmatprep.mubr.msk.f32.mxu0 %vm2227_vm1, %v2226_v36 }
 0x2a8   :  { %2077 = vmatmul.mubr.msk.f32.vlgmr.msra.gmra.mrb[12].mxu0 %vm173_vm2, %v1374_v55 }
 0x35f   :  { %v244_v63 = vpop.f32.mrb[2].mxu1 }
 0x360   :  { %v245_v2 = vadd.f32 %v244_v63, %v169_v62  ;;  %v2008_v3 = vpop.f32.mrb[3].mxu1  ;;  %v411_v4 = vpop.f32.mrb[0].mxu0 }
 0x361   :  { %v412_v5 = vadd.f32 %v411_v4, %v169_v62  ;;  %v2018_v6 = vpop.f32.mrb[1].mxu0 }
 0x362   :  { %v248_v7 = vsel %vm173_vm2, %v245_v2, -inf }
 0x363   :  { %249 = vmax.xlane.f32.xlu0 %v248_v7  ;;  %v415_v8 = vsel %vm173_vm2, %v412_v5, -inf }
 0x364   :  { %416 = vmax.xlane.f32.xlu1 %v415_v8 }
 0x367   :  { %v583_v10 = vpop.f32.mrb[2].mxu0 }
 0x368   :  { %v2400_v11 = vadd.f32 %v583_v10, %v169_v62  ;;  %v2028_v12 = vpop.f32.mrb[3].mxu0 }
 0x36a   :  { %v587_v14 = vsel %vm173_vm2, %v2400_v11, -inf }
 0x36b   :  { %588 = vmax.xlane.f32.xlu0 %v587_v14  ;;  %v755_v15 = vpop.f32.mrb[4].mxu0 }
 0x36c   :  { %v756_v16 = vadd.f32 %v755_v15, %v169_v62  ;;  %v2038_v17 = vpop.f32.mrb[5].mxu0 }
 0x36e   :  { %v759_v19 = vsel %vm173_vm2, %v756_v16, -inf }
 0x36f   :  { %760 = vmax.xlane.f32.xlu0 %v759_v19  ;;  %v938_v20 = vpop.f32.mrb[6].mxu0 }
 0x370   :  { %v939_v21 = vadd.f32 %v938_v20, %v864_v18  ;;  %v2048_v22 = vpop.f32.mrb[7].mxu0 }
 0x372   :  { %v942_v23 = vsel %vm173_vm2, %v939_v21, -inf }
 0x373   :  { %943 = vmax.xlane.f32.xlu0 %v942_v23  ;;  %v1105_v24 = vpop.f32.mrb[8].mxu0 }
 0x374   :  { %v1106_v25 = vadd.f32 %v1105_v24, %v864_v18  ;;  %v2058_v26 = vpop.f32.mrb[9].mxu0 }
 0x376   :  { %v1109_v27 = vsel %vm173_vm2, %v1106_v25, -inf }
 0x377   :  { %1110 = vmax.xlane.f32.xlu1 %v1109_v27  ;;  %v1276_v28 = vpop.f32.mrb[10].mxu0 }
 0x378   :  { %v1277_v29 = vadd.f32 %v1276_v28, %v864_v18  ;;  %v2068_v30 = vpop.f32.mrb[11].mxu0 }
 0x37a   :  { %v1280_v31 = vsel %vm173_vm2, %v1277_v29, -inf }
 0x37b   :  { %1281 = vmax.xlane.f32.xlu0 %v1280_v31  ;;  %v1447_v32 = vpop.f32.mrb[12].mxu0 }
 0x37c   :  { %v2078_v33 = vpop.f32.mrb[13].mxu0  ;;  %v1448_v34 = vadd.f32 %v1447_v32, %v864_v18 }
 0x37e   :  { %v1451_v35 = vsel %vm173_vm2, %v1448_v34, -inf }
 0x388   :  { %260 = vrot.lane.b32.xlu1 %v2335_v40, %s2235_s1 }
 0x3ac   :  { %1452 = vmax.xlane.f32.xlu1 %v1451_v35 }
 0x3bd   :  { %599 = vrot.lane.b32.xlu1 %v2335_v40, %s2236_s2 }
 0x3c1   :  { %771 = vrot.lane.b32.xlu1 %v2335_v40, %s2237_s9 }
 0x3c5   :  { %954 = vrot.lane.b32.xlu1 %v2343_v41, %s2235_s1 }
 0x3f0   :  { %v250_v37 = vpop.xlane.xlu0 %249 }
 0x3f1   :  { %v251_v38 = vsub.f32 %v245_v2, %v250_v37  ;;  %v417_v39 = vpop.xlane.xlu1 %416 }
 0x3f2   :  { %v418_v42 = vsub.f32 %v412_v5, %v417_v39 }
 0x3f3   :  { %v252_v43 = vmul.f32 1.442695, %v251_v38 }
 0x3f4   :  { %v419_v44 = vmul.f32 1.442695, %v418_v42 }
 0x3f5   :  { %2186 = vpow2.f32 %v252_v43 }
 0x3f6   :  { %2188 = vpow2.f32 %v419_v44 }
 0x3f8   :  { %v589_v45 = vpop.xlane.xlu0 %588 }
 0x3f9   :  { %v590_v57 = vsub.f32 %v2400_v11, %v589_v45 }
 0x3fb   :  { %v591_v59 = vmul.f32 1.442695, %v590_v57 }
 0x3fc   :  { %v761_v46 = vpop.xlane.xlu0 %760 }
 0x3fd   :  { %v762_v47 = vsub.f32 %v756_v16, %v761_v46 }
 0x3ff   :  { %v2187_v48 = vpop.eup %2186  ;;  %v763_v49 = vmul.f32 1.442695, %v762_v47 }
 0x400   :  { %v2189_v50 = vpop.eup %2188  ;;  %v254_v51 = vsel %vm173_vm2, %v2187_v48, 0.0  ;;  %v944_v58 = vpop.xlane.xlu0 %943 }
 0x401   :  { %2190 = vpow2.f32 %v763_v49  ;;  %255 = vadd.xlane.f32.xlu0 %v254_v51  ;;  %v421_v52 = vsel %vm173_vm2, %v2189_v50, 0.0  ;;  %v945_v60 = vsub.f32 %v939_v21, %v944_v58 }
 0x402   :  { %422 = vadd.xlane.f32.xlu1 %v421_v52  ;;  %2192 = vpow2.f32 %v591_v59 }
 0x403   :  { %v946_v62 = vmul.f32 1.442695, %v945_v60 }
 0x404   :  { %v1111_v53 = vpop.xlane.xlu1 %1110 }
 0x405   :  { %2194 = vpow2.f32 %v946_v62  ;;  %v1112_v2 = vsub.f32 %v1106_v25, %v1111_v53 }
 0x407   :  { %v1113_v4 = vmul.f32 1.442695, %v1112_v2  ;;  %v1553_v2 = vld [vmem:[%s2581_s4 + $0x8] sm:$0xff] }
 0x408   :  { %v261_v54 = vpop.permute.xlu1 %260  ;;  %v1282_v61 = vpop.xlane.xlu0 %1281 }
 0x409   :  { %2010 = vmatpush3.msra.mxu1 %v261_v54  ;;  %v1283_v63 = vsub.f32 %v1277_v29, %v1282_v61 }
 0x40a   :  { %2019 = vmatprep.subr.mxu1 %v2226_v36 }
 0x40b   :  { %v2418_v55 = vpop.eup %2190  ;;  %v1284_v3 = vmul.f32 1.442695, %v1283_v63  ;;  %v1552_v63 = vld [vmem:[%s2581_s4] sm:$0xff] }
 0x40c   :  { %v765_v56 = vsel %vm173_vm2, %v2418_v55, 0.0  ;;  %v2193_v5 = vpop.eup %2192 }
 0x40d   :  { %766 = vadd.xlane.f32.xlu1 %v765_v56  ;;  %2196 = vpow2.f32 %v1284_v3  ;;  %v2133_v3 = vpack.c.bf16 %v1553_v2, %v1552_v63 }
 0x40e   :  { %2198 = vpow2.f32 %v1113_v4 }
 0x40f   :  { %v2426_v6 = vpop.eup %2194  ;;  %2134 = vmatprep.subr.bf16.mxu0 %v2133_v3 }
 0x410   :  { %v948_v8 = vsel %vm173_vm2, %v2426_v6, 0.0  ;;  %2136 = vmatpush3.bf16.msra.mxu0 %v2133_v3 }
 0x417   :  { %427 = vrot.lane.b32.xlu0 %v2335_v40, %s2238_s10  ;;  %v593_v40 = vsel %vm173_vm2, %v2193_v5, 0.0  ;;  %v2430_v9 = vpop.eup %2196 }
 0x418   :  { %v1286_v12 = vsel %vm173_vm2, %v2430_v9, 0.0  ;;  %v2434_v13 = vpop.eup %2198 }
 0x419   :  { %v1115_v14 = vsel %vm173_vm2, %v2434_v13, 0.0 }
 0x41e   :  { %1121 = vrot.lane.b32.xlu1 %v2343_v41, %s2238_s10 }
 0x436   :  { %594 = vadd.xlane.f32.xlu0 %v593_v40  ;;  %v1555_v40 = vld [vmem:[%s2581_s4 + $0x18] sm:$0xff] }
 0x439   :  { %v1453_v7 = vpop.xlane.xlu1 %1452 }
 0x43a   :  { %v1454_v10 = vsub.f32 %v1448_v34, %v1453_v7  ;;  %949 = vadd.xlane.f32.xlu0 %v948_v8 }
 0x43c   :  { %v1455_v11 = vmul.f32 1.442695, %v1454_v10 }
 0x43d   :  { %v600_v17 = vpop.permute.xlu1 %599 }
 0x43e   :  { %2200 = vpow2.f32 %v1455_v11  ;;  %1287 = vadd.xlane.f32.xlu0 %v1286_v12 }
 0x441   :  { %v772_v18 = vpop.permute.xlu1 %771 }
 0x442   :  { %1116 = vadd.xlane.f32.xlu1 %v1115_v14 }
 0x445   :  { %v955_v19 = vpop.permute.xlu1 %954 }
 0x448   :  { %v2438_v15 = vpop.eup %2200 }
 0x449   :  { %v1457_v16 = vsel %vm173_vm2, %v2438_v15, 0.0 }
 0x44a   :  { %1458 = vadd.xlane.f32.xlu0 %v1457_v16 }
 0x453   :  { %1463 = vrot.lane.b32.xlu1 %v2343_v41, %s2237_s9 }
 0x460   :  { %1292 = vrot.lane.b32.xlu0 %v2343_v41, %s2236_s2 }
 0x48e   :  { %v256_v20 = vpop.xlane.xlu0 %255 }
 0x48f   :  { %2202 = vrcp.f32 %v256_v20  ;;  %v423_v21 = vpop.xlane.xlu1 %422 }
 0x490   :  { %2204 = vrcp.f32 %v423_v21 }
 0x492   :  { %v428_v26 = vpop.permute.xlu0 %427 }
 0x499   :  { %v2203_v22 = vpop.eup %2202 }
 0x49a   :  { %v2205_v23 = vpop.eup %2204  ;;  %v258_v24 = vmul.f32 %v2203_v22, %v2187_v48  ;;  %v767_v41 = vpop.xlane.xlu1 %766  ;;  %v1922_v22 = vld [vmem:[%s2581_s4 + $0x20] ss:$0 sm:$0xff] }
 0x49b   :  { %v425_v25 = vmul.f32 %v2205_v23, %v2189_v50  ;;  %2206 = vrcp.f32 %v767_v41 }
 0x49c   :  { %2012 = vmatmul.mubr.msk.f32.vlgmr.msra.gmra.mrb[4].mxu1 %vm173_vm2, %v258_v24 }
 0x49d   :  { %2020 = vmatpush3.msra.mxu1 %v428_v26  ;;  %2021 = vmatprep.mubr.msk.f32.mxu1 %vm2227_vm1, %v2226_v36  ;;  %v426_v27 = vadd.f32 %v425_v25, %v258_v24 }
 0x49e   :  { %2029 = vmatprep.subr.mxu1 %v2226_v36  ;;  %v1122_v30 = vpop.permute.xlu1 %1121 }
 0x4a0   :  { %2022 = vmatmul.mubr.msk.f32.vlgmr.msra.gmra.mrb[6].mxu1 %vm173_vm2, %v425_v25 }
 0x4a1   :  { %2030 = vmatpush3.msra.mxu1 %v600_v17  ;;  %2031 = vmatprep.mubr.msk.f32.mxu1 %vm2227_vm1, %v2226_v36 }
 0x4a2   :  { %2039 = vmatprep.subr.mxu1 %v2226_v36 }
 0x4a5   :  { %v2207_v32 = vpop.eup %2206 }
 0x4a6   :  { %v769_v37 = vmul.f32 %v2207_v32, %v2418_v55 }
 0x4c3   :  { %v595_v28 = vpop.xlane.xlu0 %594 }
 0x4c4   :  { %2208 = vrcp.f32 %v595_v28 }
 0x4c7   :  { %v950_v29 = vpop.xlane.xlu0 %949 }
 0x4c8   :  { %2210 = vrcp.f32 %v950_v29 }
 0x4cb   :  { %v1288_v31 = vpop.xlane.xlu0 %1287 }
 0x4cc   :  { %2212 = vrcp.f32 %v1288_v31 }
 0x4ce   :  { %v2209_v33 = vpop.eup %2208 }
 0x4cf   :  { %v597_v34 = vmul.f32 %v2209_v33, %v2193_v5  ;;  %v1117_v35 = vpop.xlane.xlu1 %1116  ;;  %v1554_v5 = vld [vmem:[%s2581_s4 + $0x10] sm:$0xff] }
 0x4d0   :  { %2214 = vrcp.f32 %v1117_v35  ;;  %v2137_v7 = vpack.c.bf16 %v1555_v40, %v1554_v5  ;;  %v1793_v5 = vld [vmem:[%s2584_s6 + $0x8] sm:$0xff] }
 0x4d1   :  { %2032 = vmatmul.mubr.msk.f32.vlgmr.msra.gmra.mrb[8].mxu1 %vm173_vm2, %v597_v34  ;;  %v598_v38 = vadd.f32 %v597_v34, %v426_v27 }
 0x4d2   :  { %2040 = vmatpush3.msra.mxu1 %v772_v18  ;;  %2041 = vmatprep.mubr.msk.f32.mxu1 %vm2227_vm1, %v2226_v36  ;;  %v2211_v42 = vpop.eup %2210 }
 0x4d3   :  { %2049 = vmatprep.subr.mxu1 %v2226_v36  ;;  %v2459_v39 = vadd.f32 %v769_v37, %v598_v38  ;;  %v952_v43 = vmul.f32 %v2211_v42, %v2426_v6  ;;  %v1464_v52 = vpop.permute.xlu1 %1463  ;;  %2138 = vmatprep.subr.bf16.mxu0 %v2137_v7 }
 0x4d4   :  { %2140 = vmatpush3.bf16.msra.mxu0 %v2137_v7  ;;  %v1795_v7 = vld [vmem:[%s2584_s6 + $0x18] sm:$0xff] }
 0x4d5   :  { %2042 = vmatmul.mubr.msk.f32.vlgmr.msra.gmra.mrb[10].mxu1 %vm173_vm2, %v769_v37 }
 0x4d6   :  { %2050 = vmatpush3.msra.mxu1 %v955_v19  ;;  %2051 = vmatprep.mubr.msk.f32.mxu1 %vm2227_vm1, %v2226_v36  ;;  %v2213_v45 = vpop.eup %2212 }
 0x4d7   :  { %v1459_v44 = vpop.xlane.xlu0 %1458  ;;  %2059 = vmatprep.subr.mxu1 %v2226_v36  ;;  %v1290_v49 = vmul.f32 %v2213_v45, %v2430_v9  ;;  %v1684_v45 = vld [vmem:[%s2583_s5] sm:$0xff] }
 0x4d8   :  { %2216 = vrcp.f32 %v1459_v44  ;;  %v853_v44 = vmul.f32 0.25, %v2459_v39  ;;  %v1687_v39 = vld [vmem:[%s2583_s5 + $0x18] sm:$0xff] }
 0x4d9   :  { %2052 = vmatmul.mubr.msk.f32.vlgmr.msra.gmra.mrb[12].mxu1 %vm173_vm2, %v952_v43 }
 0x4da   :  { %v2215_v46 = vpop.eup %2214  ;;  %2060 = vmatpush3.msra.mxu1 %v1122_v30  ;;  %2061 = vmatprep.mubr.msk.f32.mxu1 %vm2227_vm1, %v2226_v36 }
 0x4db   :  { %v1119_v47 = vmul.f32 %v2215_v46, %v2434_v13  ;;  %v1293_v48 = vpop.permute.xlu0 %1292  ;;  %2069 = vmatprep.subr.mxu1 %v2226_v36  ;;  %v1685_v46 = vld [vmem:[%s2583_s5 + $0x8] sm:$0xff] }
 0x4dd   :  { %2062 = vmatmul.mubr.msk.f32.vlgmr.msra.gmra.mrb[14].mxu1 %vm173_vm2, %v1119_v47  ;;  %v1120_v50 = vadd.f32 %v1119_v47, %v952_v43  ;;  %v2141_v47 = vpack.c.bf16 %v1685_v46, %v1684_v45 }
 0x4de   :  { %2070 = vmatpush3.msra.mxu1 %v1293_v48  ;;  %2071 = vmatprep.mubr.msk.f32.mxu1 %vm2227_vm1, %v2226_v36  ;;  %v1686_v48 = vld [vmem:[%s2583_s5 + $0x10] sm:$0xff] }
 0x4df   :  { %2079 = vmatprep.subr.mxu1 %v2226_v36  ;;  %v1291_v51 = vadd.f32 %v1290_v49, %v1120_v50 }
 0x4e1   :  { %2072 = vmatmul.mubr.msk.f32.vlgmr.msra.gmra.mrb[16].mxu1 %vm173_vm2, %v1290_v49  ;;  %v2145_v49 = vpack.c.bf16 %v1687_v39, %v1686_v48 }
 0x4e2   :  { %v2217_v53 = vpop.eup %2216  ;;  %2080 = vmatpush3.msra.mxu1 %v1464_v52  ;;  %2081 = vmatprep.mubr.msk.f32.mxu1 %vm2227_vm1, %v2226_v36 }
 0x4e3   :  { %v1461_v54 = vmul.f32 %v2217_v53, %v2438_v15  ;;  %2142 = vmatprep.subr.bf16.mxu1 %v2141_v47 }
 0x4e5   :  { %2082 = vmatmul.mubr.msk.f32.vlgmr.msra.gmra.mrb[18].mxu1 %vm173_vm2, %v1461_v54  ;;  %v2481_v55 = vadd.f32 %v1461_v54, %v1291_v51 }
 0x4e6   :  { %2144 = vmatpush3.bf16.msra.mxu1 %v2141_v47 }
 0x4e7   :  { %v1544_v30 = vmul.f32 0.25, %v2481_v55  ;;  %2146 = vmatprep.subr.bf16.mxu1 %v2145_v49 }
 0x4ea   :  { %2148 = vmatpush3.bf16.msra.mxu1 %v2145_v49 }
 0x56f   :  { %v332_v56 = vpop.f32.mrb[4].mxu1 }
 0x570   :  { %336 = vst.msk [vmem:[#allocation2] sm:$0xff] %vm173_vm2, %v332_v56  ;;  %v2013_v57 = vpop.f32.mrb[5].mxu1 }
 0x573   :  { %v499_v58 = vpop.f32.mrb[6].mxu1 }
 0x574   :  { %504 = vrot.lane.b32.xlu0 %v499_v58, %s2239_s11  ;;  %v2023_v59 = vpop.f32.mrb[7].mxu1  ;;  %v1925_v58 = vld [vmem:[%s2578_s7 + $0x2] ss:$0 sm:$0xff] }
 0x5a4   :  { %v671_v60 = vpop.f32.mrb[8].mxu1 }
 0x5a5   :  { %676 = vrot.lane.b32.xlu1 %v671_v60, %s2240_s12  ;;  %v2033_v61 = vpop.f32.mrb[9].mxu1  ;;  %v1926_v60 = vld [vmem:[%s2578_s7 + $0x3] ss:$0 sm:$0xff] }
 0x5a8   :  { %v843_v62 = vpop.f32.mrb[10].mxu1 }
 0x5a9   :  { %848 = vrot.lane.b32.xlu1 %v843_v62, %s2241_s13  ;;  %v2043_v36 = vpop.f32.mrb[11].mxu1 }
 0x5ac   :  { %v1026_v4 = vpop.f32.mrb[12].mxu1 }
 0x5ad   :  { %1030 = vst.msk [vmem:[#allocation2 + $0x8] sm:$0xff] %vm173_vm2, %v1026_v4  ;;  %v2053_v6 = vpop.f32.mrb[13].mxu1  ;;  %v1792_v4 = vld [vmem:[%s2584_s6] sm:$0xff] }
 0x5ae   :  { %v2149_v40 = vpack.c.bf16 %v1793_v5, %v1792_v4  ;;  %v1794_v6 = vld [vmem:[%s2584_s6 + $0x10] sm:$0xff] }
 0x5b0   :  { %v1193_v8 = vpop.f32.mrb[14].mxu1  ;;  %2150 = vmatprep.subr.bf16.mxu0 %v2149_v40 }
 0x5b1   :  { %1198 = vrot.lane.b32.xlu0 %v1193_v8, %s2239_s11  ;;  %v2063_v9 = vpop.f32.mrb[15].mxu1  ;;  %v2153_v8 = vpack.c.bf16 %v1795_v7, %v1794_v6 }
 0x5b2   :  { %v1796_v9 = vld [vmem:[%s2584_s6 + $0x20] sm:$0xff] }
 0x5b4   :  { %v1364_v10 = vpop.f32.mrb[16].mxu1 }
 0x5b5   :  { %1369 = vrot.lane.b32.xlu0 %v1364_v10, %s2240_s12  ;;  %v2073_v11 = vpop.f32.mrb[17].mxu1  ;;  %v1797_v10 = vld [vmem:[%s2584_s6 + $0x28] sm:$0xff] }
 0x5b6   :  { %v2157_v11 = vpack.c.bf16 %v1797_v10, %v1796_v9 }
 0x5b8   :  { %v1535_v12 = vpop.f32.mrb[18].mxu1 }
 0x5b9   :  { %1540 = vrot.lane.b32.xlu1 %v1535_v12, %s2241_s13  ;;  %v2083_v13 = vpop.f32.mrb[19].mxu1  ;;  %v1798_v12 = vld [vmem:[%s2584_s6 + $0x30] sm:$0xff] }
 0x5ba   :  { %v1799_v13 = vld [vmem:[%s2584_s6 + $0x38] sm:$0xff] }
 0x5e6   :  { %v505_v14 = vpop.permute.xlu0 %504 }
 0x5e7   :  { %508 = vst.msk [vmem:[#allocation2] sm:$0xff] %vm507_vm3, %v505_v14  ;;  %v2161_v14 = vpack.c.bf16 %v1799_v13, %v1798_v12 }
 0x617   :  { %v677_v15 = vpop.permute.xlu1 %676 }
 0x618   :  { %680 = vst.msk [vmem:[#allocation2] sm:$0xff] %vm679_vm4, %v677_v15  ;;  %v1927_v15 = vld [vmem:[%s2583_s5 + $0x20] ss:$0 sm:$0xff] }
 0x61b   :  { %v849_v16 = vpop.permute.xlu1 %848 }
 0x61c   :  { %852 = vst.msk [vmem:[#allocation2] sm:$0xff] %vm851_vm5, %v849_v16 }
 0x623   :  { %v1199_v17 = vpop.permute.xlu0 %1198  ;;  %v1550_v18 = vld [vmem:[#allocation2] sm:$0xff] }
 0x624   :  { %1201 = vst.msk [vmem:[#allocation2 + $0x8] sm:$0xff] %vm507_vm3, %v1199_v17  ;;  %2092 = vmatprep.mubr.msk.f32.mxu0 %vm33_vm0, %v1550_v18 }
 0x627   :  { %v1370_v19 = vpop.permute.xlu0 %1369 }
 0x628   :  { %1372 = vst.msk [vmem:[#allocation2 + $0x8] sm:$0xff] %vm679_vm4, %v1370_v19 }
 0x62b   :  { %v1541_v20 = vpop.permute.xlu1 %1540 }
 0x62c   :  { %1543 = vst.msk [vmem:[#allocation2 + $0x8] sm:$0xff] %vm851_vm5, %v1541_v20 }
 0x633   :  { %v1551_v21 = vld [vmem:[#allocation2 + $0x8] sm:$0xff] }
 0x634   :  { %2093 = vmatmul.mubr.msk.f32.vlgmr.msra.gmra.mrb[14].mxu0 %vm33_vm0, %v1551_v21 }
 0x635   :  { %2152 = vmatpush3.bf16.msra.mxu0 %v2149_v40 }
 0x636   :  { %2154 = vmatprep.subr.bf16.mxu0 %v2153_v8 }
 0x639   :  { %2156 = vmatpush3.bf16.msra.mxu0 %v2153_v8 }
 0x63a   :  { %2158 = vmatprep.subr.bf16.mxu0 %v2157_v11 }
 0x63d   :  { %2160 = vmatpush3.bf16.msra.mxu0 %v2157_v11 }
 0x63e   :  { %2162 = vmatprep.subr.bf16.mxu0 %v2161_v14 }
 0x641   :  { %2164 = vmatpush3.bf16.msra.mxu0 %v2161_v14 }
 0x707   :  { %v2094_v23 = vpop.f32.mrb[14].mxu0 }
 0x708   :  { %v1639_v24 = vadd.f32 %v2094_v23, %v1922_v22  ;;  %v1633_v25 = vpop.f32.mrb[15].mxu0 }
 0x709   :  { %v1634_v26 = vadd.f32 %v1922_v22, %v1633_v25 }
 0x70a   :  { %v1643_v27 = vadd.f32 %v1639_v24, %v2296_v1 }
 0x70b   :  { %v1642_v41 = vadd.f32 %v1634_v26, %v2291_v0 }
 0x70c   :  { %v1649_v28 = vsel %vm33_vm0, %v1643_v27, 0.0 }
 0x70d   :  { %1650 = vadd.xlane.f32.xlu1 %v1649_v28  ;;  %v1646_v29 = vsel %vm33_vm0, %v1642_v41, 0.0 }
 0x70e   :  { %1647 = vadd.xlane.f32.xlu0 %v1646_v29 }
 0x71e   :  { %1546 = vrot.lane.b32.xlu1 %v1544_v30, %s2242_s24 }
 0x79a   :  { %v1651_v31 = vpop.xlane.xlu1 %1650 }
 0x79b   :  { %v1653_v32 = vmul.f32 0.03125, %v1651_v31  ;;  %v1648_v33 = vpop.xlane.xlu0 %1647 }
 0x79c   :  { %v1652_v34 = vmul.f32 0.03125, %v1648_v33 }
 0x79d   :  { %v1655_v35 = vsub.f32 %v1643_v27, %v1653_v32 }
 0x79e   :  { %v1654_v37 = vsub.f32 %v1642_v41, %v1652_v34  ;;  %v1547_v1 = vpop.permute.xlu1 %1546 }
 0x79f   :  { %1549 = vst.msk [vmem:[%s2582_s8 + $0x8] sm:$0xff] %vm858_vm6, %v1547_v1  ;;  %v1657_v42 = vmul.f32 %v1655_v35, %v1655_v35  ;;  %v1930_v1 = vld [vmem:[%s2584_s6 + $0x40] ss:$0 sm:$0xff] }
 0x7a0   :  { %v1656_v0 = vmul.f32 %v1654_v37, %v1654_v37 }
 0x7a1   :  { %v1661_v43 = vsel %vm33_vm0, %v1657_v42, 0.0 }
 0x7a2   :  { %v1658_v38 = vsel %vm33_vm0, %v1656_v0, 0.0 }
 0x7a3   :  { %1659 = vadd.xlane.f32.xlu0 %v1658_v38 }
 0x7a7   :  { %1662 = vadd.xlane.f32.xlu0 %v1661_v43 }
 0x7bd   :  { %855 = vrot.lane.b32.xlu0 %v853_v44, %s2242_s24 }
 0x830   :  { %v1660_v50 = vpop.xlane.xlu0 %1659 }
 0x831   :  { %v1664_v51 = vmul.f32 0.03125, %v1660_v50 }
 0x833   :  { %v1666_v52 = vadd.f32 1e-05, %v1664_v51 }
 0x834   :  { %v1663_v53 = vpop.xlane.xlu0 %1662 }
 0x835   :  { %2218 = vrsqrt.f32 %v1666_v52  ;;  %v1665_v54 = vmul.f32 0.03125, %v1663_v53 }
 0x837   :  { %v1667_v55 = vadd.f32 1e-05, %v1665_v54 }
 0x838   :  { %v856_v56 = vpop.permute.xlu0 %855 }
 0x839   :  { %2220 = vrsqrt.f32 %v1667_v55  ;;  %859 = vst.msk [vmem:[%s2582_s8] sm:$0xff] %vm858_vm6, %v856_v56 }
 0x83f   :  { %v2219_v57 = vpop.eup %2218 }
 0x840   :  { %v1670_v59 = vmul.f32 %v2219_v57, %v1654_v37 }
 0x842   :  { %v1676_v61 = vmul.f32 %v1925_v58, %v1670_v59 }
 0x843   :  { %v2221_v62 = vpop.eup %2220 }
 0x844   :  { %v1671_v36 = vmul.f32 %v2221_v62, %v1655_v35  ;;  %v1682_v63 = vadd.f32 %v1926_v60, %v1676_v61 }
 0x846   :  { %v1677_v2 = vmul.f32 %v1925_v58, %v1671_v36  ;;  %2103 = vmatprep.mubr.msk.f32.mxu1 %vm33_vm0, %v1682_v63 }
 0x848   :  { %v1683_v3 = vadd.f32 %v1926_v60, %v1677_v2 }
 0x84a   :  { %2104 = vmatmul.mubr.msk.f32.vlgmr.msra.gmra.mrb[20].mxu1 %vm33_vm0, %v1683_v3 }
 0x91d   :  { %v2105_v16 = vpop.f32.mrb[20].mxu1 }
 0x91e   :  { %v1771_v17 = vadd.f32 %v2105_v16, %v1927_v15  ;;  %v1765_v18 = vpop.f32.mrb[21].mxu1 }
 0x91f   :  { %v1766_v19 = vadd.f32 %v1927_v15, %v1765_v18 }
 0x920   :  { %v1775_v20 = vmul.f32 %v1771_v17, %v1771_v17 }
 0x921   :  { %v1774_v21 = vmul.f32 %v1766_v19, %v1766_v19 }
 0x922   :  { %v1777_v22 = vmul.f32 %v1775_v20, %v1771_v17 }
 0x923   :  { %v1776_v23 = vmul.f32 %v1774_v21, %v1766_v19 }
 0x924   :  { %v1779_v24 = vmul.f32 0.044715, %v1777_v22 }
 0x925   :  { %v1778_v25 = vmul.f32 0.044715, %v1776_v23 }
 0x926   :  { %v1781_v26 = vadd.f32 %v1779_v24, %v1771_v17 }
 0x927   :  { %v1780_v27 = vadd.f32 %v1778_v25, %v1766_v19 }
 0x928   :  { %v1783_v41 = vmul.f32 0.7978846, %v1781_v26 }
 0x929   :  { %v1782_v28 = vmul.f32 0.7978846, %v1780_v27 }
 0x92a   :  { %2222 = vtanh.f32 %v1783_v41 }
 0x92b   :  { %2224 = vtanh.f32 %v1782_v28 }
 0x934   :  { %v2223_v29 = vpop.eup %2222 }
 0x935   :  { %v2225_v30 = vpop.eup %2224  ;;  %v1787_v31 = vadd.f32 1.0, %v2223_v29 }
 0x936   :  { %v1786_v32 = vadd.f32 1.0, %v2225_v30 }
 0x937   :  { %v1789_v33 = vmul.f32 0.5, %v1787_v31 }
 0x938   :  { %v1788_v34 = vmul.f32 0.5, %v1786_v32 }
 0x939   :  { %v1791_v37 = vmul.f32 %v1789_v33, %v1771_v17 }
 0x93a   :  { %v1790_v35 = vmul.f32 %v1788_v34, %v1766_v19 }
 0x93c   :  { %2122 = vmatprep.mubr.msk.f32.mxu0 %vm1805_vm7, %v1790_v35 }
 0x93d   :  { %2123 = vmatmul.mubr.msk.f32.vlgmr.msra.gmra.mrb[16].mxu0 %vm1805_vm7, %v1791_v37 }
 0xa10   :  { %v2124_v0 = vpop.f32.mrb[16].mxu0 }
 0xa11   :  { %v1884_v38 = vadd.f32 %v2124_v0, %v1930_v1  ;;  %v1878_v42 = vpop.f32.mrb[17].mxu0 }
 0xa12   :  { %v1879_v43 = vadd.f32 %v1930_v1, %v1878_v42 }
 0xa13   :  { %1888 = vst.msk [vmem:[%s2582_s8 + $0x8] sm:$0xff] %vm33_vm0, %v1884_v38 }
 0xa14   :  { %1887 = vst.msk [vmem:[%s2582_s8] sm:$0xff] %vm33_vm0, %v1879_v43 }

</bundles_post_ra>
